<compile_context>
chip_gen: v7x
topology: tpu7x:2x2x1
jax: 0.10.0
libtpu: 0.0.40
codegen_flags: <defaults>
</compile_context>

<pallas_src>
import jax
import jax.numpy as jnp
from jax.experimental import pallas as pl
from jax.experimental.pallas import tpu as pltpu


def _round_up(x, m):
    return ((x + m - 1) // m) * m


def _num_tensorcores():
    """Best-effort TensorCores-per-chip (2 on v7x / megacore chips, else 1)."""
    try:
        info = pltpu.get_tpu_info()
        for attr in ("num_cores", "num_tensorcores", "tensorcores_per_chip",
                     "cores_per_chip", "core_count"):
            v = getattr(info, attr, None)
            if isinstance(v, int) and v > 0:
                return max(1, min(2, v))
    except Exception:
        pass
    try:
        kind = jax.devices()[0].device_kind.lower()
        if "v7" in kind or "v4" in kind or "v5p" in kind:
            return 2
        if kind.strip() in ("tpu v5", "tpu v5p"):
            return 2
    except Exception:
        pass
    return 1


def critic_kernel(state_ref, w1_ref, b1_ref, w2_ref, b2_ref, w3_ref, b3_ref,
                  out_ref):
    """Fused MLP for one batch tile, entirely in VMEM.

    state_ref: (TB, state_dim)
    w1_ref: (state_dim, 64)   b1_ref: (1, 64)
    w2_ref: (64, 32)          b2_ref: (1, 32)
    w3_ref: (1, 32)           b3_ref: (1, 1)
    out_ref: (1, TB)          lane-dense value row (one value per batch row)
    """
    x = state_ref[...]

    h1 = jnp.dot(x, w1_ref[...], preferred_element_type=jnp.float32)
    h1 = jnp.tanh(h1 + b1_ref[...])

    h2 = jnp.dot(h1, w2_ref[...], preferred_element_type=jnp.float32)
    h2 = jnp.tanh(h2 + b2_ref[...])

    # Final 32 -> 1 layer: an N=1 matmul wastes the MXU; do a VPU multiply +
    # lane (XLU) reduction instead, landing in the lane-dense output row.
    # (Alternative: lax.dot_general(w3 (1,32), h2 (TB,32)) lands (1,TB) straight
    # off the MXU; XLU has slack at these sizes so the simple form is kept.)
    v = jnp.sum(h2 * w3_ref[...], axis=-1)                    # (TB,)
    out_ref[...] = (v[None, :] + b3_ref[...]).astype(out_ref.dtype)


def critic_forward(state, params, *, tb_max=8192):
    """state: (B, state_dim) float32. Returns (B, 1) float32."""
    w1, b1, w2, b2, w3, b3 = params
    B, state_dim = state.shape

    # --- batch-tile selection ---------------------------------------------
    # tb is a multiple of 128 (lane-dense output row).  Single-TC chips
    # (v5e/v6e) get one tile as large as possible (up to tb_max ~ 1 MiB of
    # state per step); 2-TC chips (v7x / megacore) get a step count rounded to
    # a multiple of the core count so the "parallel" batch axis load-balances.
    num_cores = _num_tensorcores()
    b_up = _round_up(B, 128)
    tb = min(max(128, (int(tb_max) // 128) * 128), b_up)
    if num_cores > 1:
        min_tiles = num_cores * (2 if b_up >= num_cores * 2 * 2048 else 1)
        n_target = _round_up(max(pl.cdiv(b_up, tb), min_tiles), num_cores)
        tb = max(128, _round_up(pl.cdiv(b_up, n_target), 128))

    # Ragged last block: no jnp.pad copy of the state.  The overhanging rows of
    # the last input block read undefined data, but those rows only feed output
    # lanes that are sliced off below.  Only the output allocation is padded.
    n_tiles = pl.cdiv(B, tb)
    out_cols = n_tiles * tb

    whole = lambda i: (0, 0)  # constant block index: weights stay resident

    # Scoped-VMEM budget: double-buffered state blocks (lane-padded to 128) plus
    # h1/h2 intermediates, with margin.  Mainly matters on v5e (16 MiB default);
    # stays well below physical VMEM everywhere (v7x: 64 MiB/TC).
    state_block_bytes = tb * 128 * 4
    vmem_limit = int(min(48 << 20, max(16 << 20, 10 * state_block_bytes)))

    flops = 2 * B * (state_dim * 64 + 64 * 32 + 32)
    transcendentals = B * (64 + 32)
    bytes_accessed = 4 * (B * state_dim + B + state_dim * 64 + 64
                          + 64 * 32 + 32 + 32 + 1)

    out = pl.pallas_call(
        critic_kernel,
        out_shape=jax.ShapeDtypeStruct((1, out_cols), jnp.float32),
        grid_spec=pl.GridSpec(
            grid=(n_tiles,),
            in_specs=[
                pl.BlockSpec((tb, state_dim), lambda i: (i, 0)),  # state tile
                pl.BlockSpec(w1.shape, whole),                    # W1
                pl.BlockSpec(b1.shape, whole),                    # b1
                pl.BlockSpec(w2.shape, whole),                    # W2
                pl.BlockSpec(b2.shape, whole),                    # b2
                pl.BlockSpec(w3.shape, whole),                    # W3 (1,32)
                pl.BlockSpec(b3.shape, whole),                    # b3 (1,1)
            ],
            out_specs=pl.BlockSpec((1, tb), lambda i: (0, i)),    # lane-dense
        ),
        compiler_params=pltpu.CompilerParams(
            dimension_semantics=("parallel",),
            vmem_limit_bytes=vmem_limit),
        cost_estimate=pl.CostEstimate(
            flops=flops,
            transcendentals=transcendentals,
            bytes_accessed=bytes_accessed),
    )(state, w1, b1, w2, b2, w3, b3)

    # Lane-dense (1, out_cols) -> (B, 1).  Callers that can consume the flat
    # row directly should use out[0, :B] and skip this tiny relayout.
    return out[0, :B][:, None]


def init_params(key, state_dim):
    """Deterministic init mirroring the nn.Linear shapes.

    W1/W2 are stored transposed (in, out); W3 stays in PyTorch layout (1, 32).
    """
    ks = jax.random.split(key, 6)

    def linear(kw, kb, fan_in, fan_out):
        # PyTorch default init: U(-1/sqrt(fan_in), 1/sqrt(fan_in))
        bound = 1.0 / jnp.sqrt(jnp.float32(fan_in))
        w = jax.random.uniform(kw, (fan_in, fan_out), jnp.float32, -bound, bound)
        b = jax.random.uniform(kb, (1, fan_out), jnp.float32, -bound, bound)
        return w, b

    w1, b1 = linear(ks[0], ks[1], state_dim, 64)
    w2, b2 = linear(ks[2], ks[3], 64, 32)
    w3_t, b3 = linear(ks[4], ks[5], 32, 1)       # (32, 1), (1, 1)
    w3 = w3_t.T                                  # (1, 32), PyTorch layout
    return (w1, b1, w2, b2, w3, b3)


def critic_ref(state, params):
    """Pure-JAX reference for correctness check."""
    w1, b1, w2, b2, w3, b3 = params
    h1 = jnp.tanh(state @ w1 + b1)
    h2 = jnp.tanh(h1 @ w2 + b2)
    return h2 @ w3.T + b3


if __name__ == "__main__":
    key = jax.random.PRNGKey(0)
    k_param, k0, k1, k2, k3 = jax.random.split(key, 5)

    state_dim = 32
    params = init_params(k_param, state_dim)

    # Small shape consistent with the module, plus ragged / multi-tile cases.
    for kb, B in ((k0, 8), (k1, 300), (k2, 2000), (k3, 10000)):
        state = jax.random.normal(kb, (B, state_dim), dtype=jnp.float32)
        value = jax.block_until_ready(critic_forward(state, params))
        ref = critic_ref(state, params)
        assert value.shape == (B, 1), (value.shape, B)
        assert jnp.allclose(value, ref, atol=1e-5, rtol=1e-5), f"mismatch at B={B}"

    print("KERNEL_OK")
</pallas_src>

<mosaic_0001>
module attributes {stable_mosaic.version = 11 : i64} {
  func.func @critic_kernel(%arg0: i32, %arg1: memref<128x32xf32, #tpu.memory_space<vmem>>, %arg2: memref<32x64xf32, #tpu.memory_space<vmem>>, %arg3: memref<1x64xf32, #tpu.memory_space<vmem>>, %arg4: memref<64x32xf32, #tpu.memory_space<vmem>>, %arg5: memref<1x32xf32, #tpu.memory_space<vmem>>, %arg6: memref<1x32xf32, #tpu.memory_space<vmem>>, %arg7: memref<1x1xf32, #tpu.memory_space<vmem>>, %arg8: memref<1x128xf32, #tpu.memory_space<vmem>>) attributes {dimension_semantics = [#tpu.dimension_semantics<parallel>], iteration_bounds = array<i64: 1>, scalar_prefetch = 0 : i64, scratch_operands = 0 : i64, tpu.core_type = #tpu.core_type<tc>, window_params = [{transform_indices = @transform_0, window_bounds = array<i64: 128, 32>}, {pipeline_mode = #tpu.pipeline_mode<synchronous>, transform_indices = @transform_1, window_bounds = array<i64: 32, 64>}, {pipeline_mode = #tpu.pipeline_mode<synchronous>, transform_indices = @transform_2, window_bounds = array<i64: 1, 64>}, {pipeline_mode = #tpu.pipeline_mode<synchronous>, transform_indices = @transform_3, window_bounds = array<i64: 64, 32>}, {pipeline_mode = #tpu.pipeline_mode<synchronous>, transform_indices = @transform_4, window_bounds = array<i64: 1, 32>}, {pipeline_mode = #tpu.pipeline_mode<synchronous>, transform_indices = @transform_5, window_bounds = array<i64: 1, 32>}, {pipeline_mode = #tpu.pipeline_mode<synchronous>, transform_indices = @transform_6, window_bounds = array<i64: 1, 1>}, {transform_indices = @transform_7, window_bounds = array<i64: 1, 128>}]} {
    %c0 = arith.constant 0 : index
    %c0_0 = arith.constant 0 : index
    %0 = vector.load %arg1[%c0, %c0_0] : memref<128x32xf32, #tpu.memory_space<vmem>>, vector<128x32xf32>
    %c0_1 = arith.constant 0 : index
    %c0_2 = arith.constant 0 : index
    %1 = vector.load %arg2[%c0_1, %c0_2] : memref<32x64xf32, #tpu.memory_space<vmem>>, vector<32x64xf32>
    %cst = arith.constant dense<0.000000e+00> : vector<128x64xf32>
    %2 = tpu.matmul %0, %1, %cst {dimension_numbers = #tpu.dot_dimension_numbers<[1], [0], [0], [1], [0, 0, 1, 1], [], []>} : vector<128x32xf32>, vector<32x64xf32>, vector<128x64xf32> -> vector<128x64xf32>
    %c0_3 = arith.constant 0 : index
    %c0_4 = arith.constant 0 : index
    %3 = vector.load %arg3[%c0_3, %c0_4] : memref<1x64xf32, #tpu.memory_space<vmem>>, vector<1x64xf32>
    %4 = vector.broadcast %3 : vector<1x64xf32> to vector<128x64xf32>
    %5 = arith.addf %2, %4 : vector<128x64xf32>
    %6 = math.tanh %5 : vector<128x64xf32>
    %c0_5 = arith.constant 0 : index
    %c0_6 = arith.constant 0 : index
    %7 = vector.load %arg4[%c0_5, %c0_6] : memref<64x32xf32, #tpu.memory_space<vmem>>, vector<64x32xf32>
    %cst_7 = arith.constant dense<0.000000e+00> : vector<128x32xf32>
    %8 = tpu.matmul %6, %7, %cst_7 {dimension_numbers = #tpu.dot_dimension_numbers<[1], [0], [0], [1], [0, 0, 1, 1], [], []>} : vector<128x64xf32>, vector<64x32xf32>, vector<128x32xf32> -> vector<128x32xf32>
    %c0_8 = arith.constant 0 : index
    %c0_9 = arith.constant 0 : index
    %9 = vector.load %arg5[%c0_8, %c0_9] : memref<1x32xf32, #tpu.memory_space<vmem>>, vector<1x32xf32>
    %10 = vector.broadcast %9 : vector<1x32xf32> to vector<128x32xf32>
    %11 = arith.addf %8, %10 : vector<128x32xf32>
    %12 = math.tanh %11 : vector<128x32xf32>
    %c0_10 = arith.constant 0 : index
    %c0_11 = arith.constant 0 : index
    %13 = vector.load %arg6[%c0_10, %c0_11] : memref<1x32xf32, #tpu.memory_space<vmem>>, vector<1x32xf32>
    %14 = vector.broadcast %13 : vector<1x32xf32> to vector<128x32xf32>
    %15 = arith.mulf %12, %14 : vector<128x32xf32>
    %cst_12 = arith.constant dense<0.000000e+00> : vector<128xf32>
    %16 = vector.multi_reduction <add>, %15, %cst_12 [1] : vector<128x32xf32> to vector<128xf32>
    %17 = vector.shape_cast %16 : vector<128xf32> to vector<1x128xf32>
    %c0_13 = arith.constant 0 : index
    %c0_14 = arith.constant 0 : index
    %18 = vector.load %arg7[%c0_13, %c0_14] : memref<1x1xf32, #tpu.memory_space<vmem>>, vector<1x1xf32>
    %19 = vector.broadcast %18 : vector<1x1xf32> to vector<1x128xf32>
    %20 = arith.addf %17, %19 : vector<1x128xf32>
    %c0_15 = arith.constant 0 : index
    %c0_16 = arith.constant 0 : index
    %21 = vector.load %arg8[%c0_15, %c0_16] : memref<1x128xf32, #tpu.memory_space<vmem>>, vector<1x128xf32>
    tpu.vector_store %arg8[%c0_15, %c0_16], %20 {strides = array<i32>} : memref<1x128xf32, #tpu.memory_space<vmem>>, vector<1x128xf32>,
    return
  }
  func.func @transform_0(%arg0: i32) -> (i32, i32) {
    %c0_i32 = arith.constant 0 : i32
    %c0_i32_0 = arith.constant 0 : i32
    return %arg0, %c0_i32 : i32, i32
  }
  func.func @transform_1(%arg0: i32) -> (i32, i32) {
    %c0_i32 = arith.constant 0 : i32
    %c0_i32_0 = arith.constant 0 : i32
    %c0_i32_1 = arith.constant 0 : i32
    return %c0_i32, %c0_i32_0 : i32, i32
  }
  func.func @transform_2(%arg0: i32) -> (i32, i32) {
    %c0_i32 = arith.constant 0 : i32
    %c0_i32_0 = arith.constant 0 : i32
    %c0_i32_1 = arith.constant 0 : i32
    return %c0_i32, %c0_i32_0 : i32, i32
  }
  func.func @transform_3(%arg0: i32) -> (i32, i32) {
    %c0_i32 = arith.constant 0 : i32
    %c0_i32_0 = arith.constant 0 : i32
    %c0_i32_1 = arith.constant 0 : i32
    return %c0_i32, %c0_i32_0 : i32, i32
  }
  func.func @transform_4(%arg0: i32) -> (i32, i32) {
    %c0_i32 = arith.constant 0 : i32
    %c0_i32_0 = arith.constant 0 : i32
    %c0_i32_1 = arith.constant 0 : i32
    return %c0_i32, %c0_i32_0 : i32, i32
  }
  func.func @transform_5(%arg0: i32) -> (i32, i32) {
    %c0_i32 = arith.constant 0 : i32
    %c0_i32_0 = arith.constant 0 : i32
    %c0_i32_1 = arith.constant 0 : i32
    return %c0_i32, %c0_i32_0 : i32, i32
  }
  func.func @transform_6(%arg0: i32) -> (i32, i32) {
    %c0_i32 = arith.constant 0 : i32
    %c0_i32_0 = arith.constant 0 : i32
    %c0_i32_1 = arith.constant 0 : i32
    return %c0_i32, %c0_i32_0 : i32, i32
  }
  func.func @transform_7(%arg0: i32) -> (i32, i32) {
    %c0_i32 = arith.constant 0 : i32
    %c0_i32_0 = arith.constant 0 : i32
    return %c0_i32, %arg0 : i32, i32
  }
}

</mosaic_0001>

<bundles_post_ra>
// kernel: tpu_custom_call.1
= control target key start
LH: loop header
LB: loop body
LE: loop exit
PB: predicated region body
PF: predicated region fallthrough
CT: control target
= control target key end

     0   :  { %s1315_s0 = inlined_call_operand.vmem [shape: f32[8,32], index: 0, kind: input, shape index: {}]   ;;  %s1316_s1 = inlined_call_operand.vmem [shape: f32[32,64], index: 1, kind: input, shape index: {}]   ;;  %s1317_s2 = inlined_call_operand.vmem [shape: f32[1,64], index: 2, kind: input, shape index: {}]   ;;  %s1318_s3 = inlined_call_operand.vmem [shape: f32[64,32], index: 3, kind: input, shape index: {}]   ;;  %s1319_s4 = inlined_call_operand.vmem [shape: f32[1,32], index: 4, kind: input, shape index: {}]   ;;  %s1320_s5 = inlined_call_operand.vmem [shape: f32[1,32], index: 5, kind: input, shape index: {}]   ;;  %s1321_s6 = inlined_call_operand.<no memory space> [shape: f32[1,1], index: 6, kind: input, shape index: {}]   ;;  %s1322_s7 = inlined_call_operand.hbm [shape: f32[1,128], index: 7, kind: output, shape index: {}]  }
   0x1   :  { %v12_v0 = vstv %s1321_s6 }
   0x2   :  { %13 = vst [vmem:[#allocation2] sm:$0x1] %v12_v0 }
   0x3   :  { %v45_v1 = vld [vmem:[%s1316_s1] sm:$0xff]  ;;  %v46_v2 = vld [vmem:[%s1316_s1 + $0x8] sm:$0xff]  ;;  %v47_v3 = vld [vmem:[%s1316_s1 + $0x10] sm:$0xff]  ;;  %vm56_vm0 = vcmask 261120  }
   0x4   :  { %v882_v4 = vpack.c.bf16 %v46_v2, %v45_v1  ;;  %v48_v5 = vld [vmem:[%s1316_s1 + $0x18] sm:$0xff]  ;;  %v29_v6 = vld [vmem:[%s1315_s0] sm:$0xff] }
   0x5   :  { %v886_v7 = vpack.c.bf16 %v48_v5, %v47_v3  ;;  %818 = vmatprep.mubr.msk.f32.mxu0 %vm56_vm0, %v29_v6 }
   0x6   :  { %883 = vmatprep.subr.bf16.mxu0 %v882_v4 }
   0x7   :  { %885 = vmatpush3.bf16.msra.mxu0 %v882_v4 }
   0x8   :  { %887 = vmatprep.subr.bf16.mxu0 %v886_v7 }
   0x9   :  { %14 = vsyncpa [#allocation4], 0  ;;  %v30_v8 = vld [vmem:[%s1315_s0 + $0x8] sm:$0xff]  ;;  %v31_v9 = vld [vmem:[%s1315_s0 + $0x10] sm:$0xff]  ;;  %vm281_vm1 = vcmask 523264   ;;  %vm615_vm2 = vcmask 130112  }
   0xa   :  { %v32_v10 = vld [vmem:[%s1315_s0 + $0x18] sm:$0xff]  ;;  %v33_v11 = vld [vmem:[%s1315_s0 + $0x20] sm:$0xff]  ;;  %v34_v12 = vld [vmem:[%s1315_s0 + $0x28] sm:$0xff]  ;;  %vm622_vm3 = vcmask 195712   ;;  %vm629_vm4 = vcmask 261312   ;;  %vm636_vm5 = vcmask 326912  }
   0xb   :  { %889 = vmatpush3.bf16.msra.mxu0 %v886_v7  ;;  %v35_v13 = vld [vmem:[%s1315_s0 + $0x30] sm:$0xff]  ;;  %v36_v14 = vld [vmem:[%s1315_s0 + $0x38] sm:$0xff]  ;;  %v37_v15 = vld [vmem:[%s1315_s0 + $0x40] sm:$0xff]  ;;  %vm643_vm6 = vcmask 392512   ;;  %vm650_vm7 = vcmask 458112   ;;  %vm657_vm8 = vcmask 523712  }
   0xc   :  { %v38_v16 = vld [vmem:[%s1315_s0 + $0x48] sm:$0xff]  ;;  %v39_v17 = vld [vmem:[%s1315_s0 + $0x50] sm:$0xff]  ;;  %v40_v18 = vld [vmem:[%s1315_s0 + $0x58] sm:$0xff]  ;;  %vm664_vm9 = vcmask 589312   ;;  %vm671_vm10 = vcmask 654912   ;;  %vm678_vm11 = vcmask 720512  }
   0xd   :  { %v41_v19 = vld [vmem:[%s1315_s0 + $0x60] sm:$0xff]  ;;  %v42_v20 = vld [vmem:[%s1315_s0 + $0x68] sm:$0xff]  ;;  %v43_v21 = vld [vmem:[%s1315_s0 + $0x70] sm:$0xff]  ;;  %vm685_vm12 = vcmask 786112   ;;  %vm692_vm13 = vcmask 851712   ;;  %vm699_vm14 = vcmask 917312  }
   0xe   :  { %819 = vmatmul.mubr.msk.f32.vlgmr.msra.gmra.mrb[0].mxu0 %vm56_vm0, %v30_v8  ;;  %v44_v22 = vld [vmem:[%s1315_s0 + $0x78] sm:$0xff]  ;;  %v266_v23 = vld [vmem:[%s1318_s3] sm:$0xff]  ;;  %v267_v24 = vld [vmem:[%s1318_s3 + $0x8] sm:$0xff]  ;;  %vm706_vm15 = vcmask 982912  }
   0xf   :  { %821 = vmatprep.mubr.msk.f32.mxu0 %vm56_vm0, %v31_v9  ;;  %v890_v25 = vpack.c.bf16 %v267_v24, %v266_v23  ;;  %v268_v26 = vld [vmem:[%s1318_s3 + $0x10] sm:$0xff]  ;;  %v269_v27 = vld [vmem:[%s1318_s3 + $0x18] sm:$0xff]  ;;  %v270_v29 = vld [vmem:[%s1318_s3 + $0x20] sm:$0xff] }
  0x10   :  { %v894_v28 = vpack.c.bf16 %v269_v27, %v268_v26  ;;  %v271_v30 = vld [vmem:[%s1318_s3 + $0x28] sm:$0xff]  ;;  %v272_v32 = vld [vmem:[%s1318_s3 + $0x30] sm:$0xff]  ;;  %v273_v33 = vld [vmem:[%s1318_s3 + $0x38] sm:$0xff] }
  0x11   :  { %891 = vmatprep.subr.bf16.mxu0 %v890_v25  ;;  %906 = vmatprep.subr.bf16.mxu1 %v890_v25  ;;  %v898_v31 = vpack.c.bf16 %v271_v30, %v270_v29  ;;  %v902_v34 = vpack.c.bf16 %v273_v33, %v272_v32  ;;  %v1154_v35 = vld [vmem:[%s1317_s2] ss:$0 sm:$0xff] }
  0x12   :  { %822 = vmatmul.mubr.msk.f32.gmra.mrb[2].mxu0 %vm56_vm0, %v32_v10  ;;  %910 = vmatpush3.bf16.msra.mxu1 %v890_v25 }
  0x13   :  { %824 = vmatprep.mubr.msk.f32.mxu0 %vm56_vm0, %v33_v11  ;;  %893 = vmatpush3.bf16.msra.mxu0 %v890_v25 }
  0x14   :  { %895 = vmatprep.subr.bf16.mxu0 %v894_v28  ;;  %907 = vmatprep.subr.bf16.mxu1 %v894_v28 }
  0x16   :  { %825 = vmatmul.mubr.msk.f32.gmra.mrb[4].mxu0 %vm56_vm0, %v34_v12  ;;  %911 = vmatpush3.bf16.msra.mxu1 %v894_v28 }
  0x17   :  { %827 = vmatprep.mubr.msk.f32.mxu0 %vm56_vm0, %v35_v13  ;;  %897 = vmatpush3.bf16.msra.mxu0 %v894_v28 }
  0x18   :  { %899 = vmatprep.subr.bf16.mxu0 %v898_v31  ;;  %908 = vmatprep.subr.bf16.mxu1 %v898_v31 }
  0x1a   :  { %828 = vmatmul.mubr.msk.f32.gmra.mrb[6].mxu0 %vm56_vm0, %v36_v14  ;;  %912 = vmatpush3.bf16.msra.mxu1 %v898_v31 }
  0x1b   :  { %830 = vmatprep.mubr.msk.f32.mxu0 %vm56_vm0, %v37_v15  ;;  %901 = vmatpush3.bf16.msra.mxu0 %v898_v31 }
  0x1c   :  { %903 = vmatprep.subr.bf16.mxu0 %v902_v34  ;;  %909 = vmatprep.subr.bf16.mxu1 %v902_v34 }
  0x1e   :  { %831 = vmatmul.mubr.msk.f32.gmra.mrb[8].mxu0 %vm56_vm0, %v38_v16  ;;  %913 = vmatpush3.bf16.msra.mxu1 %v902_v34 }
  0x1f   :  { %833 = vmatprep.mubr.msk.f32.mxu0 %vm56_vm0, %v39_v17  ;;  %905 = vmatpush3.bf16.msra.mxu0 %v902_v34  ;;  %v1202_v34 = vld [vmem:[%s1320_s5] ss:$0 sm:$0xff]  ;;  %s1007_s5 = smov [#allocation3]  }
  0x20   :  { %s723_s6 = sshll.u32 %s1007_s5, 4  ;;  %s724_s6 = int_to_ptr.vmem [resolvable:$true] %s723_s6 }
  0x21   :  { %s982_s11 = scalar_lea.vmem %s724_s6, 16  ;;  %s986_s12 = scalar_lea.vmem %s724_s6, 32 }
  0x22   :  { %834 = vmatmul.mubr.msk.f32.gmra.mrb[10].mxu0 %vm56_vm0, %v40_v18  ;;  %p983_p0 = scmp.ne.s32.totalorder %s724_s6, %s982_s11  ;;  %p987_p1 = scmp.lt.s32.totalorder %s724_s6, %s724_s6 }
  0x23   :  { %836 = vmatprep.mubr.msk.f32.mxu0 %vm56_vm0, %v41_v19  ;;  %p988_p2 = scmp.lt.s32.totalorder %s986_s12, %s982_s11 }
  0x25   :  { %p989_p3 = por %p988_p2, %p987_p1 }
  0x26   :  { %837 = vmatmul.mubr.msk.f32.gmra.mrb[12].mxu0 %vm56_vm0, %v42_v20  ;;  %v1006_v20 = vmov 0  }
  0x27   :  { %839 = vmatprep.mubr.msk.f32.mxu0 %vm56_vm0, %v43_v21  ;;  %916 = vset.pattern.permute.xlu1 %v1006_v20  ;;  %v1191_v21 = vld [vmem:[%s1319_s4] ss:$0 sm:$0xff]  ;;  %p990_p4 = pnand %p989_p3, %p983_p0 }
  0x28   :  { %917 = vset.pattern.permute.xlu0 %v1006_v20 }
  0x2a   :  { %840 = vmatmul.mubr.msk.f32.gmra.mrb[14].mxu0 %vm56_vm0, %v44_v22 }
  0xe1   :  { %v820_v36 = vpop.f32.mrb[0].mxu0 }
  0xe2   :  { %v177_v37 = vadd.f32 %v820_v36, %v1154_v35  ;;  %v171_v38 = vpop.f32.mrb[1].mxu0 }
  0xe3   :  { %v172_v39 = vadd.f32 %v1154_v35, %v171_v38 }
  0xe5   :  { %918 = vtanh.f32 %v172_v39  ;;  %v823_v40 = vpop.f32.mrb[2].mxu0 }
  0xe6   :  { %920 = vtanh.f32 %v177_v37  ;;  %v187_v41 = vadd.f32 %v823_v40, %v1154_v35  ;;  %v181_v42 = vpop.f32.mrb[3].mxu0 }
  0xe7   :  { %v182_v43 = vadd.f32 %v1154_v35, %v181_v42 }
  0xe9   :  { %922 = vtanh.f32 %v182_v43  ;;  %v826_v44 = vpop.f32.mrb[4].mxu0 }
  0xea   :  { %924 = vtanh.f32 %v187_v41  ;;  %v197_v45 = vadd.f32 %v826_v44, %v1154_v35  ;;  %v191_v46 = vpop.f32.mrb[5].mxu0 }
  0xeb   :  { %v192_v47 = vadd.f32 %v1154_v35, %v191_v46 }
  0xec   :  { %926 = vtanh.f32 %v197_v45 }
  0xed   :  { %928 = vtanh.f32 %v192_v47  ;;  %v829_v48 = vpop.f32.mrb[6].mxu0 }
  0xee   :  { %v207_v49 = vadd.f32 %v829_v48, %v1154_v35  ;;  %v201_v50 = vpop.f32.mrb[7].mxu0 }
  0xef   :  { %v919_v51 = vpop.eup %918  ;;  %v202_v52 = vadd.f32 %v1154_v35, %v201_v50 }
  0xf0   :  { %v921_v53 = vpop.eup %920  ;;  %930 = vtanh.f32 %v207_v49  ;;  %858 = vmatprep.mubr.msk.f32.mxu0 %vm281_vm1, %v919_v51 }
  0xf1   :  { %932 = vtanh.f32 %v202_v52  ;;  %859 = vmatmul.mubr.msk.f32.vlgmr.msra.gmra.mrb[16].mxu0 %vm281_vm1, %v921_v53  ;;  %v832_v54 = vpop.f32.mrb[8].mxu0 }
  0xf2   :  { %v217_v55 = vadd.f32 %v832_v54, %v1154_v35  ;;  %v211_v56 = vpop.f32.mrb[9].mxu0 }
  0xf3   :  { %v923_v57 = vpop.eup %922  ;;  %v212_v58 = vadd.f32 %v1154_v35, %v211_v56 }
  0xf4   :  { %v925_v59 = vpop.eup %924  ;;  %861 = vmatprep.mubr.msk.f32.mxu1 %vm281_vm1, %v923_v57  ;;  %934 = vtanh.f32 %v217_v55 }
  0xf5   :  { %862 = vmatmul.mubr.msk.f32.vlgmr.msra.gmra.mrb[0].mxu1 %vm281_vm1, %v925_v59  ;;  %936 = vtanh.f32 %v212_v58  ;;  %v835_v60 = vpop.f32.mrb[10].mxu0 }
  0xf6   :  { %v927_v61 = vpop.eup %926  ;;  %v227_v62 = vadd.f32 %v835_v60, %v1154_v35  ;;  %v221_v63 = vpop.f32.mrb[11].mxu0 }
  0xf7   :  { %v929_v0 = vpop.eup %928  ;;  %v222_v1 = vadd.f32 %v1154_v35, %v221_v63 }
  0xf8   :  { %864 = vmatprep.mubr.msk.f32.mxu1 %vm281_vm1, %v929_v0  ;;  %938 = vtanh.f32 %v227_v62 }
  0xf9   :  { %865 = vmatmul.mubr.msk.f32.gmra.mrb[2].mxu1 %vm281_vm1, %v927_v61  ;;  %940 = vtanh.f32 %v222_v1  ;;  %v838_v2 = vpop.f32.mrb[12].mxu0 }
  0xfa   :  { %v931_v3 = vpop.eup %930  ;;  %v237_v4 = vadd.f32 %v838_v2, %v1154_v35  ;;  %v231_v5 = vpop.f32.mrb[13].mxu0 }
  0xfb   :  { %v933_v6 = vpop.eup %932  ;;  %v232_v7 = vadd.f32 %v1154_v35, %v231_v5 }
  0xfc   :  { %867 = vmatprep.mubr.msk.f32.mxu1 %vm281_vm1, %v933_v6  ;;  %942 = vtanh.f32 %v237_v4 }
  0xfd   :  { %868 = vmatmul.mubr.msk.f32.gmra.mrb[4].mxu1 %vm281_vm1, %v931_v3  ;;  %944 = vtanh.f32 %v232_v7  ;;  %v841_v8 = vpop.f32.mrb[14].mxu0 }
  0xfe   :  { %v935_v9 = vpop.eup %934  ;;  %v247_v10 = vadd.f32 %v841_v8, %v1154_v35  ;;  %v241_v11 = vpop.f32.mrb[15].mxu0 }
  0xff   :  { %v937_v12 = vpop.eup %936  ;;  %v242_v13 = vadd.f32 %v1154_v35, %v241_v11 }
 0x100   :  { %870 = vmatprep.mubr.msk.f32.mxu1 %vm281_vm1, %v937_v12  ;;  %946 = vtanh.f32 %v247_v10 }
 0x101   :  { %871 = vmatmul.mubr.msk.f32.gmra.mrb[6].mxu1 %vm281_vm1, %v935_v9  ;;  %948 = vtanh.f32 %v242_v13 }
 0x102   :  { %v939_v14 = vpop.eup %938 }
 0x103   :  { %v941_v15 = vpop.eup %940 }
 0x104   :  { %873 = vmatprep.mubr.msk.f32.mxu1 %vm281_vm1, %v941_v15 }
 0x105   :  { %874 = vmatmul.mubr.msk.f32.gmra.mrb[8].mxu1 %vm281_vm1, %v939_v14 }
 0x106   :  { %v943_v16 = vpop.eup %942 }
 0x107   :  { %v945_v17 = vpop.eup %944 }
 0x108   :  { %876 = vmatprep.mubr.msk.f32.mxu1 %vm281_vm1, %v945_v17 }
 0x109   :  { %877 = vmatmul.mubr.msk.f32.gmra.mrb[10].mxu1 %vm281_vm1, %v943_v16 }
 0x10a   :  { %v947_v18 = vpop.eup %946 }
 0x10b   :  { %v949_v19 = vpop.eup %948 }
 0x10c   :  { %879 = vmatprep.mubr.msk.f32.mxu1 %vm281_vm1, %v949_v19 }
 0x10d   :  { %880 = vmatmul.mubr.msk.f32.gmra.mrb[12].mxu1 %vm281_vm1, %v947_v18 }
 0x1c4   :  { %v860_v22 = vpop.f32.mrb[16].mxu0 }
 0x1c5   :  { %v402_v23 = vadd.f32 %v860_v22, %v1191_v21  ;;  %v396_v24 = vpop.f32.mrb[17].mxu0 }
 0x1c6   :  { %v397_v25 = vadd.f32 %v1191_v21, %v396_v24 }
 0x1c7   :  { %950 = vtanh.f32 %v402_v23 }
 0x1c8   :  { %952 = vtanh.f32 %v397_v25  ;;  %v863_v26 = vpop.f32.mrb[0].mxu1 }
 0x1c9   :  { %v412_v27 = vadd.f32 %v863_v26, %v1191_v21  ;;  %v406_v28 = vpop.f32.mrb[1].mxu1 }
 0x1ca   :  { %v407_v29 = vadd.f32 %v1191_v21, %v406_v28 }
 0x1cb   :  { %954 = vtanh.f32 %v412_v27  ;;  %v562_v27 = vld [vmem:[#allocation2] sm:$0x1] }
 0x1cc   :  { %956 = vtanh.f32 %v407_v29  ;;  %v866_v30 = vpop.f32.mrb[2].mxu1 }
 0x1cd   :  { %v422_v31 = vadd.f32 %v866_v30, %v1191_v21  ;;  %v416_v32 = vpop.f32.mrb[3].mxu1 }
 0x1ce   :  { %v417_v33 = vadd.f32 %v1191_v21, %v416_v32 }
 0x1cf   :  { %958 = vtanh.f32 %v422_v31 }
 0x1d0   :  { %960 = vtanh.f32 %v417_v33  ;;  %v869_v35 = vpop.f32.mrb[4].mxu1 }
 0x1d1   :  { %v951_v36 = vpop.eup %950  ;;  %v432_v37 = vadd.f32 %v869_v35, %v1191_v21  ;;  %v426_v38 = vpop.f32.mrb[5].mxu1 }
 0x1d2   :  { %v953_v39 = vpop.eup %952  ;;  %v427_v40 = vadd.f32 %v1191_v21, %v426_v38  ;;  %v499_v41 = vmul.f32 %v951_v36, %v1202_v34 }
 0x1d3   :  { %962 = vtanh.f32 %v432_v37  ;;  %v498_v44 = vmul.f32 %v953_v39, %v1202_v34 }
 0x1d4   :  { %964 = vtanh.f32 %v427_v40  ;;  %v517_v42 = vsel %vm56_vm0, %v499_v41, 0.0  ;;  %v872_v43 = vpop.f32.mrb[6].mxu1 }
 0x1d5   :  { %v955_v45 = vpop.eup %954  ;;  %518 = vadd.xlane.f32.xlu0 %v517_v42  ;;  %v442_v46 = vadd.f32 %v872_v43, %v1191_v21  ;;  %v436_v47 = vpop.f32.mrb[7].mxu1  ;;  %v514_v52 = vsel %vm56_vm0, %v498_v44, 0.0 }
 0x1d6   :  { %v957_v48 = vpop.eup %956  ;;  %v501_v49 = vmul.f32 %v955_v45, %v1202_v34  ;;  %v437_v50 = vadd.f32 %v1191_v21, %v436_v47  ;;  %v568_v47 = vlaneseq }
 0x1d7   :  { %966 = vtanh.f32 %v442_v46  ;;  %v500_v53 = vmul.f32 %v957_v48, %v1202_v34 }
 0x1d8   :  { %v523_v51 = vsel %vm56_vm0, %v501_v49, 0.0  ;;  %v875_v54 = vpop.f32.mrb[8].mxu1  ;;  %968 = vtanh.f32 %v437_v50  ;;  %v1246_v50 = vshrl.u32 %v568_v47, 7 }
 0x1d9   :  { %v959_v55 = vpop.eup %958  ;;  %524 = vadd.xlane.f32.xlu1 %v523_v51  ;;  %515 = vadd.xlane.f32.xlu0 %v514_v52  ;;  %v452_v56 = vadd.f32 %v875_v54, %v1191_v21  ;;  %v446_v57 = vpop.f32.mrb[9].mxu1  ;;  %v520_v61 = vsel %vm56_vm0, %v500_v53, 0.0  ;;  %v1249_v51 = vand.u32 127, %v568_v47 }
 0x1da   :  { %v961_v58 = vpop.eup %960  ;;  %v447_v59 = vadd.f32 %v1191_v21, %v446_v57  ;;  %v503_v62 = vmul.f32 %v959_v55, %v1202_v34 }
 0x1db   :  { %v502_v60 = vmul.f32 %v961_v58, %v1202_v34  ;;  %970 = vtanh.f32 %v452_v56  ;;  %v610_v55 = vadd.s32 4294967288, %v1249_v51  ;;  %v617_v56 = vadd.s32 4294967280, %v1249_v51 }
 0x1dc   :  { %v878_v63 = vpop.f32.mrb[10].mxu1  ;;  %972 = vtanh.f32 %v447_v59  ;;  %v529_v7 = vsel %vm56_vm0, %v503_v62, 0.0  ;;  %v694_v47 = vadd.s32 4294967192, %v1249_v51 }
 0x1dd   :  { %v963_v0 = vpop.eup %962  ;;  %521 = vadd.xlane.f32.xlu1 %v520_v61  ;;  %v526_v1 = vsel %vm56_vm0, %v502_v60, 0.0  ;;  %v456_v2 = vpop.f32.mrb[11].mxu1  ;;  %v462_v5 = vadd.f32 %v878_v63, %v1191_v21  ;;  %v608_v60 = vsub.s32 %v1249_v51, %v1246_v50  ;;  %v613_v61 = vsub.s32 %v610_v55, %v1246_v50 }
 0x1de   :  { %v965_v3 = vpop.eup %964  ;;  %527 = vadd.xlane.f32.xlu0 %v526_v1  ;;  %v505_v4 = vmul.f32 %v963_v0, %v1202_v34  ;;  %v457_v12 = vadd.f32 %v1191_v21, %v456_v2  ;;  %v620_v63 = vsub.s32 %v617_v56, %v1246_v50  ;;  %v624_v2 = vadd.s32 4294967272, %v1249_v51 }
 0x1df   :  { %v504_v6 = vmul.f32 %v965_v3, %v1202_v34  ;;  %974 = vtanh.f32 %v462_v5  ;;  %v631_v5 = vadd.s32 4294967264, %v1249_v51 }
 0x1e0   :  { %v535_v8 = vsel %vm56_vm0, %v505_v4, 0.0  ;;  %v881_v9 = vpop.f32.mrb[12].mxu1  ;;  %976 = vtanh.f32 %v457_v12 }
 0x1e1   :  { %v967_v10 = vpop.eup %966  ;;  %530 = vadd.xlane.f32.xlu1 %v529_v7  ;;  %v466_v11 = vpop.f32.mrb[13].mxu1  ;;  %v532_v13 = vsel %vm56_vm0, %v504_v6, 0.0  ;;  %v472_v23 = vadd.f32 %v881_v9, %v1191_v21  ;;  %v638_v9 = vadd.s32 4294967256, %v1249_v51  ;;  %v634_v12 = vsub.s32 %v631_v5, %v1246_v50 }
 0x1e2   :  { %536 = vadd.xlane.f32.xlu0 %v535_v8  ;;  %v507_v14 = vmul.f32 %v967_v10, %v1202_v34  ;;  %v969_v15 = vpop.eup %968  ;;  %v467_v17 = vadd.f32 %v1191_v21, %v466_v11  ;;  %v627_v8 = vsub.s32 %v624_v2, %v1246_v50 }
 0x1e3   :  { %v506_v20 = vmul.f32 %v969_v15, %v1202_v34  ;;  %v645_v15 = vadd.s32 4294967248, %v1249_v51 }
 0x1e4   :  { %v541_v19 = vsel %vm56_vm0, %v507_v14, 0.0  ;;  %978 = vtanh.f32 %v467_v17 }
 0x1e5   :  { %v971_v16 = vpop.eup %970  ;;  %v538_v24 = vsel %vm56_vm0, %v506_v20, 0.0  ;;  %980 = vtanh.f32 %v472_v23  ;;  %v648_v20 = vsub.s32 %v645_v15, %v1246_v50 }
 0x1e6   :  { %533 = vadd.xlane.f32.xlu0 %v532_v13  ;;  %v509_v18 = vmul.f32 %v971_v16, %v1202_v34  ;;  %v973_v22 = vpop.eup %972 }
 0x1e7   :  { %v508_v25 = vmul.f32 %v973_v22, %v1202_v34  ;;  %v652_v22 = vadd.s32 4294967240, %v1249_v51 }
 0x1e8   :  { %v547_v40 = vsel %vm56_vm0, %v509_v18, 0.0  ;;  %v641_v18 = vsub.s32 %v638_v9, %v1246_v50 }
 0x1e9   :  { %v975_v26 = vpop.eup %974  ;;  %v544_v28 = vsel %vm56_vm0, %v508_v25, 0.0  ;;  %v659_v25 = vadd.s32 4294967232, %v1249_v51 }
 0x1ea   :  { %542 = vadd.xlane.f32.xlu0 %v541_v19  ;;  %v511_v29 = vmul.f32 %v975_v26, %v1202_v34  ;;  %v977_v30 = vpop.eup %976 }
 0x1eb   :  { %v510_v21 = vmul.f32 %v977_v30, %v1202_v34 }
 0x1ec   :  { %v553_v31 = vsel %vm56_vm0, %v511_v29, 0.0 }
 0x1ed   :  { %v550_v33 = vsel %vm56_vm0, %v510_v21, 0.0 }
 0x1ee   :  { %539 = vadd.xlane.f32.xlu0 %v538_v24  ;;  %v979_v32 = vpop.eup %978 }
 0x1ef   :  { %v512_v35 = vmul.f32 %v979_v32, %v1202_v34  ;;  %v981_v36 = vpop.eup %980  ;;  %v662_v32 = vsub.s32 %v659_v25, %v1246_v50 }
 0x1f0   :  { %v513_v38 = vmul.f32 %v981_v36, %v1202_v34  ;;  %v570_v34 = vsub.s32 0, %v1246_v50 }
 0x1f1   :  { %v556_v37 = vsel %vm56_vm0, %v512_v35, 0.0  ;;  %v673_v35 = vadd.s32 4294967216, %v1249_v51 }
 0x1f2   :  { %565 = vperm.xlu1 %916, %v562_v27   ;;  %545 = vadd.xlane.f32.xlu0 %v544_v28  ;;  %v559_v39 = vsel %vm56_vm0, %v513_v38, 0.0  ;;  %v666_v28 = vadd.s32 4294967224, %v1249_v51  ;;  %vm713_vm0 = vcmask 1048512  }
 0x1f4   :  { %v669_v38 = vsub.s32 %v666_v28, %v1246_v50 }
 0x1f6   :  { %554 = vadd.xlane.f32.xlu0 %v553_v31  ;;  %v655_v31 = vsub.s32 %v652_v22, %v1246_v50 }
 0x1fa   :  { %551 = vadd.xlane.f32.xlu0 %v550_v33 }
 0x1fe   :  { %557 = vadd.xlane.f32.xlu0 %v556_v37 }
 0x202   :  { %560 = vadd.xlane.f32.xlu0 %v559_v39 }
 0x216   :  { %548 = vadd.xlane.f32.xlu1 %v547_v40  ;;  %v680_v40 = vadd.s32 4294967208, %v1249_v51 }
 0x262   :  { %v519_v41 = vpop.xlane.xlu0 %518 }
 0x266   :  { %v516_v42 = vpop.xlane.xlu0 %515  ;;  %v525_v43 = vpop.xlane.xlu1 %524 }
 0x26a   :  { %v522_v45 = vpop.xlane.xlu1 %521 }
 0x26b   :  { %v528_v44 = vpop.xlane.xlu0 %527 }
 0x26e   :  { %v531_v48 = vpop.xlane.xlu1 %530 }
 0x26f   :  { %v537_v46 = vpop.xlane.xlu0 %536 }
 0x272   :  { %v566_v52 = vpop.permute.xlu1 %565 }
 0x273   :  { %v534_v49 = vpop.xlane.xlu0 %533  ;;  %v1251_v54 = vrot.slane %v566_v52, %v570_v34  ;;  %v683_v34 = vsub.s32 %v680_v40, %v1246_v50 }
 0x275   :  { %v572_v58 = vadd.f32 %v1251_v54, %v516_v42  ;;  %v573_v59 = vadd.f32 %v1251_v54, %v519_v41  ;;  %v574_v62 = vadd.f32 %v1251_v54, %v522_v45  ;;  %v575_v6 = vadd.f32 %v1251_v54, %v525_v43 }
 0x276   :  { %v576_v10 = vadd.f32 %v1251_v54, %v528_v44  ;;  %v577_v16 = vadd.f32 %v1251_v54, %v531_v48  ;;  %v578_v24 = vadd.f32 %v1251_v54, %v534_v49  ;;  %v579_v30 = vadd.f32 %v1251_v54, %v537_v46 }
 0x277   :  { %v543_v53 = vpop.xlane.xlu0 %542  ;;  %v609_v0 = vrot.slane %v572_v58, %v608_v60  ;;  %v614_v1 = vrot.slane %v573_v59, %v613_v61  ;;  %v621_v4 = vrot.slane %v574_v62, %v620_v63  ;;  %v628_v14 = vrot.slane %v575_v6, %v627_v8 }
 0x278   :  { %v635_v19 = vrot.slane %v576_v10, %v634_v12  ;;  %v642_v27 = vrot.slane %v577_v16, %v641_v18  ;;  %v649_v21 = vrot.slane %v578_v24, %v648_v20  ;;  %v656_v39 = vrot.slane %v579_v30, %v655_v31 }
 0x279   :  { %v616_v7 = vsel %vm615_vm2, %v614_v1, %v609_v0  ;;  %v676_v42 = vsub.s32 %v673_v35, %v1246_v50  ;;  %v687_v44 = vadd.s32 4294967200, %v1249_v51  ;;  %v581_v45 = vadd.f32 %v1251_v54, %v543_v53 }
 0x27a   :  { %v623_v11 = vsel %vm622_vm3, %v621_v4, %v616_v7  ;;  %v701_v48 = vadd.s32 4294967184, %v1249_v51  ;;  %v708_v49 = vadd.s32 4294967176, %v1249_v51  ;;  %v697_v60 = vsub.s32 %v694_v47, %v1246_v50 }
 0x27b   :  { %v540_v57 = vpop.xlane.xlu0 %539  ;;  %v630_v17 = vsel %vm629_vm4, %v628_v14, %v623_v11  ;;  %v690_v56 = vsub.s32 %v687_v44, %v1246_v50  ;;  %v670_v59 = vrot.slane %v581_v45, %v669_v38 }
 0x27c   :  { %v637_v23 = vsel %vm636_vm5, %v635_v19, %v630_v17  ;;  %v580_v33 = vadd.f32 %v1251_v54, %v540_v57  ;;  %v704_v51 = vsub.s32 %v701_v48, %v1246_v50  ;;  %v711_v0 = vsub.s32 %v708_v49, %v1246_v50 }
 0x27d   :  { %v644_v29 = vsel %vm643_vm6, %v642_v27, %v637_v23 }
 0x27e   :  { %v651_v36 = vsel %vm650_vm7, %v649_v21, %v644_v29  ;;  %v663_v41 = vrot.slane %v580_v33, %v662_v32 }
 0x27f   :  { %v546_v3 = vpop.xlane.xlu0 %545  ;;  %v658_v46 = vsel %vm657_vm8, %v656_v39, %v651_v36 }
 0x280   :  { %v582_v43 = vadd.f32 %v1251_v54, %v546_v3  ;;  %v665_v52 = vsel %vm664_vm9, %v663_v41, %v658_v46 }
 0x281   :  { %v672_v1 = vsel %vm671_vm10, %v670_v59, %v665_v52 }
 0x282   :  { %v677_v55 = vrot.slane %v582_v43, %v676_v42 }
 0x283   :  { %v555_v13 = vpop.xlane.xlu0 %554 }
 0x284   :  { %v585_v61 = vadd.f32 %v1251_v54, %v555_v13  ;;  %v679_v4 = vsel %vm678_vm11, %v677_v55, %v672_v1 }
 0x286   :  { %v698_v6 = vrot.slane %v585_v61, %v697_v60 }
 0x287   :  { %v552_v26 = vpop.xlane.xlu0 %551 }
 0x288   :  { %v584_v57 = vadd.f32 %v1251_v54, %v552_v26 }
 0x28a   :  { %v691_v5 = vrot.slane %v584_v57, %v690_v56 }
 0x28b   :  { %v558_v37 = vpop.xlane.xlu0 %557 }
 0x28c   :  { %v586_v63 = vadd.f32 %v1251_v54, %v558_v37 }
 0x28e   :  { %v705_v8 = vrot.slane %v586_v63, %v704_v51 }
 0x28f   :  { %v561_v58 = vpop.xlane.xlu0 %560 }
 0x290   :  { %v587_v2 = vadd.f32 %v1251_v54, %v561_v58 }
 0x292   :  { %v712_v50 = vrot.slane %v587_v2, %v711_v0 }
 0x2a3   :  { %v549_v53 = vpop.xlane.xlu1 %548 }
 0x2a4   :  { %v583_v62 = vadd.f32 %v1251_v54, %v549_v53 }
 0x2a6   :  { %v684_v3 = vrot.slane %v583_v62, %v683_v34 }
 0x2a8   :  { %v686_v7 = vsel %vm685_vm12, %v684_v3, %v679_v4 }
 0x2a9   :  { %v693_v9 = vsel %vm692_vm13, %v691_v5, %v686_v7 }
 0x2aa   :  { %v700_v10 = vsel %vm699_vm14, %v698_v6, %v693_v9 }
 0x2ab   :  { %v707_v11 = vsel %vm706_vm15, %v705_v8, %v700_v10 }
 0x2ac   :  { %v714_v12 = vsel %vm713_vm0, %v712_v50, %v707_v11 }
 0x2ad   :  { %716 = vst [vmem:[#allocation3] sm:$0x1] %v714_v12 }
 0x2ae   :  { %993 = shalt.err (!%p990_p4)
}
 0x2af   :  { %s994_s15 = scalar_lea.hbm %s1322_s7, 16 }
 0x2b0   :  { %p995_p5 = scmp.ne.s32.totalorder %s1322_s7, %s994_s15  ;;  %p998_p6 = scmp.lt.u32.totalorder %s994_s15, %s1322_s7 }
 0x2b2   :  { %p1000_p7 = pnand %p998_p6, %p995_p5 }
 0x2b4   :  { %1003 = shalt.err (!%p1000_p7)
}
 0x2b5   :  { %726 = dma.vmem_to_hbm [thread:$0]  %s724_s6, 16, %s1322_s7, [#allocation4]  }
 0x2b6   :  { %1004 = dma.done.wait [#allocation4], 16  }
 0x2b7   :  { %1005 = vsyncadd [#allocation4], 4294967280 }
 0x2b8   :  { %730 = vsyncpa [#allocation4], 1 }

</bundles_post_ra>
